<compile_context>
chip_gen: v6e
topology: v6e:2x2x1
jax: 0.10.0
libtpu: 0.0.40
codegen_flags: <defaults>
</compile_context>

<pallas_src>
import functools

import jax
import jax.numpy as jnp
from jax.experimental import pallas as pl
from jax.experimental.pallas import tpu as pltpu

LANE = 128
SUBLANE = 8
MAX_TILE_ROWS = 8192   # 8192x128 f32 = 4 MiB/block; x2 inputs x2 buffers = 16 MiB VMEM
SLICE_UNROLL = 8       # sublane-slices per unrolled fori_loop step


def _coral_partial_kernel(x_ref, t_ref, out_ref, *, tile_rows, n_inner,
                          n_tiles, rows, needs_row_mask, has_phantom):
    o = pl.program_id(0)          # parallel chunk (megacore shard on v7x)
    i = pl.program_id(1)          # tile within chunk (sequential accumulation)
    g = o * n_inner + i           # global tile index

    @pl.when(i == 0)
    def _init():
        out_ref[...] = jnp.zeros_like(out_ref)

    n_slices = tile_rows // SUBLANE
    unroll = min(SLICE_UNROLL, n_slices)

    def reduce_tile(masked):
        # Slice-wise streaming reduction: 4 resident (8,128) f32 accumulators
        # carried through the loop; no full-tile temporaries in VMEM.
        row0 = (n_tiles - 1) * tile_rows  # static; masked path is last tile only

        def body(s, carry):
            ax, axx, at, att = carry
            r = pl.multiple_of(s * SUBLANE, SUBLANE)
            xs = x_ref[pl.ds(r, SUBLANE), :].astype(jnp.float32)
            ts = t_ref[pl.ds(r, SUBLANE), :].astype(jnp.float32)
            if masked:
                local = jax.lax.broadcasted_iota(jnp.int32, (SUBLANE, LANE), 0)
                valid = (row0 + s * SUBLANE + local) < rows
                xs = jnp.where(valid, xs, 0.0)
                ts = jnp.where(valid, ts, 0.0)
            return (ax + xs, axx + xs * xs, at + ts, att + ts * ts)

        zero = jnp.zeros((SUBLANE, LANE), jnp.float32)
        ax, axx, at, att = jax.lax.fori_loop(
            0, n_slices, body, (zero, zero, zero, zero), unroll=unroll)
        out_ref[0, 0] += ax
        out_ref[0, 1] += axx
        out_ref[0, 2] += at
        out_ref[0, 3] += att

    if needs_row_mask:
        # Only traced when rows % tile_rows != 0: the last tile reads past the
        # array; zero its invalid rows.  All other tiles take the fast path.
        is_last = g == (n_tiles - 1)
        if has_phantom:
            full_cond = jnp.logical_and(g < n_tiles, jnp.logical_not(is_last))
        else:
            full_cond = jnp.logical_not(is_last)

        @pl.when(full_cond)
        def _full():
            reduce_tile(masked=False)

        @pl.when(is_last)
        def _tail():
            reduce_tile(masked=True)
    elif has_phantom:
        @pl.when(g < n_tiles)
        def _full():
            reduce_tile(masked=False)
    else:
        reduce_tile(masked=False)


def coral(inputs, targets):
    """CORAL forward: abs(corrcoef(x,x) - corrcoef(t,t)) over all elements."""
    x = inputs.reshape(-1)
    t = targets.reshape(-1)
    n = x.shape[0]
    assert t.shape[0] == n, "inputs and targets must have the same element count"

    # Lane-major 2-D slab; keep rows a multiple of 8 (one sublane group).
    slab = SUBLANE * LANE
    n_pad = pl.cdiv(n, slab) * slab
    if n_pad != n:
        # Copy only when n is not 1024-aligned; zero padding contributes
        # nothing to sum / sum-of-squares, so the pad needs no masking.
        x = jnp.pad(x, (0, n_pad - n))
        t = jnp.pad(t, (0, n_pad - n))
    rows = n_pad // LANE
    x2d = x.reshape(rows, LANE)
    t2d = t.reshape(rows, LANE)

    tile_rows = min(rows, MAX_TILE_ROWS)              # multiple of 8
    n_tiles = pl.cdiv(rows, tile_rows)
    # Split the tile axis across 2 "parallel" outer chunks whenever there are
    # >= 2 tiles so the v7x megacore (2 TCs) can each stream their half of HBM.
    # TODO(synk): if plain "parallel" is not honored across TCs on v7x, switch
    # the outer dim to pltpu.CORE_PARALLEL gated on pltpu.get_tpu_info().
    n_outer = 2 if n_tiles >= 2 else 1
    n_inner = pl.cdiv(n_tiles, n_outer)
    has_phantom = (n_outer * n_inner != n_tiles)      # odd tile count
    needs_row_mask = (rows != n_tiles * tile_rows)    # partial last tile

    if has_phantom:
        def in_idx(o, i):
            # Clamp the phantom tile's block index to a valid tile (its
            # contribution is skipped in-kernel), avoiding any OOB DMA.
            return (jnp.minimum(o * n_inner + i, n_tiles - 1), 0)
    else:
        def in_idx(o, i):
            return (o * n_inner + i, 0)

    kernel = functools.partial(
        _coral_partial_kernel,
        tile_rows=tile_rows, n_inner=n_inner, n_tiles=n_tiles, rows=rows,
        needs_row_mask=needs_row_mask, has_phantom=has_phantom,
    )

    bytes_accessed = (x2d.size * x2d.dtype.itemsize
                      + t2d.size * t2d.dtype.itemsize
                      + n_outer * 4 * SUBLANE * LANE * 4)

    partials = pl.pallas_call(
        kernel,
        out_shape=jax.ShapeDtypeStruct((n_outer, 4, SUBLANE, LANE), jnp.float32),
        grid_spec=pltpu.PrefetchScalarGridSpec(
            num_scalar_prefetch=0,
            grid=(n_outer, n_inner),
            in_specs=[
                pl.BlockSpec((tile_rows, LANE), in_idx),
                pl.BlockSpec((tile_rows, LANE), in_idx),
            ],
            out_specs=pl.BlockSpec((1, 4, SUBLANE, LANE),
                                   lambda o, i: (o, 0, 0, 0)),
        ),
        compiler_params=pltpu.CompilerParams(
            dimension_semantics=("parallel", "arbitrary"),
            vmem_limit_bytes=32 * 1024 * 1024,
        ),
        cost_estimate=pl.CostEstimate(
            flops=6 * n, transcendentals=0, bytes_accessed=bytes_accessed),
    )(x2d, t2d)

    # Tiny scalar epilogue: combine per-chunk per-lane partials and apply the
    # corrcoef formula.  Clamp the single-pass variance (sumsq - sum^2/n) at 0
    # so fp cancellation cannot produce sqrt(negative) -> NaN.
    sums = jnp.sum(partials, axis=(0, 2, 3), dtype=jnp.float32)  # (4,)
    sx, sxx, st, stt = sums[0], sums[1], sums[2], sums[3]
    nf = jnp.float32(n)
    var_x = jnp.maximum(sxx - sx * sx / nf, 0.0)   # == sum((x - mean_x)^2)
    var_t = jnp.maximum(stt - st * st / nf, 0.0)
    # corrcoef(x, x) = sum(vx*vx) / (sqrt(sum(vx^2)) * sqrt(sum(vx^2)))
    ci = var_x / (jnp.sqrt(var_x) * jnp.sqrt(var_x))
    co = var_t / (jnp.sqrt(var_t) * jnp.sqrt(var_t))
    # torch.norm(scalar, 2) == abs(scalar)
    return jnp.abs(ci - co)


def _coral_ref(inputs, targets):
    def corrcoef(x, y):
        vx = x - jnp.mean(x)
        vy = y - jnp.mean(y)
        return jnp.sum(vx * vy) / (
            jnp.sqrt(jnp.sum(vx ** 2)) * jnp.sqrt(jnp.sum(vy ** 2))
        )

    ci = corrcoef(inputs, inputs)
    co = corrcoef(targets, targets)
    return jnp.abs(ci - co)


if __name__ == "__main__":
    key = jax.random.PRNGKey(0)
    k1, k2 = jax.random.split(key)
    # NCHW, like the PyTorch module's conv-style inputs.
    inputs = jax.random.normal(k1, (2, 4, 16, 16), dtype=jnp.float32)
    targets = jax.random.normal(k2, (2, 4, 16, 16), dtype=jnp.float32)

    out = coral(inputs, targets)
    jax.block_until_ready(out)

    ref = _coral_ref(inputs, targets)
    assert jnp.isfinite(out), "kernel produced non-finite output"
    assert jnp.abs(out - ref) < 1e-5, (out, ref)
    print("KERNEL_OK")
</pallas_src>

<mosaic_0001>
module attributes {stable_mosaic.version = 11 : i64} {
  func.func @_coral_partial_kernel(%arg0: i32, %arg1: i32, %arg2: memref<16x128xf32, #tpu.memory_space<vmem>>, %arg3: memref<16x128xf32, #tpu.memory_space<vmem>>, %arg4: memref<1x4x8x128xf32, #tpu.memory_space<vmem>>) attributes {dimension_semantics = [#tpu.dimension_semantics<parallel>, #tpu.dimension_semantics<arbitrary>], iteration_bounds = array<i64: 1, 1>, scalar_prefetch = 0 : i64, scratch_operands = 0 : i64, tpu.core_type = #tpu.core_type<tc>, window_params = [{transform_indices = @transform_0, window_bounds = array<i64: 16, 128>}, {transform_indices = @transform_1, window_bounds = array<i64: 16, 128>}, {transform_indices = @transform_2, window_bounds = array<i64: 1, 4, 8, 128>}]} {
    %c0_i32 = arith.constant 0 : i32
    %0 = arith.cmpi eq, %arg1, %c0_i32 : i32
    %1 = arith.extui %0 : i1 to i32
    %c0_i32_0 = arith.constant 0 : i32
    %2 = arith.cmpi ne, %1, %c0_i32_0 : i32
    scf.if %2 {
      %cst_35 = arith.constant 0.000000e+00 : f32
      %52 = vector.broadcast %cst_35 : f32 to vector<1x4x8x128xf32>
      %c0_36 = arith.constant 0 : index
      %c0_37 = arith.constant 0 : index
      %c0_38 = arith.constant 0 : index
      %c0_39 = arith.constant 0 : index
      %53 = vector.load %arg4[%c0_36, %c0_37, %c0_38, %c0_39] : memref<1x4x8x128xf32, #tpu.memory_space<vmem>>, vector<1x4x8x128xf32>
      tpu.vector_store %arg4[%c0_36, %c0_37, %c0_38, %c0_39], %52 {strides = array<i32>} : memref<1x4x8x128xf32, #tpu.memory_space<vmem>>, vector<1x4x8x128xf32>,
    } else {
    }
    %cst = arith.constant 0.000000e+00 : f32
    %3 = vector.broadcast %cst : f32 to vector<8x128xf32>
    %c0_i32_1 = arith.constant 0 : i32
    %c8_i32 = arith.constant 8 : i32
    %4 = arith.muli %c0_i32_1, %c8_i32 : i32
    %5 = tpu.assume_multiple %4, 8 : i32
    %6 = arith.index_cast %5 : i32 to index
    %c0 = arith.constant 0 : index
    %7 = vector.load %arg2[%6, %c0] : memref<16x128xf32, #tpu.memory_space<vmem>>, vector<8x128xf32>
    %8 = arith.index_cast %5 : i32 to index
    %c0_2 = arith.constant 0 : index
    %9 = vector.load %arg3[%8, %c0_2] : memref<16x128xf32, #tpu.memory_space<vmem>>, vector<8x128xf32>
    %10 = arith.addf %3, %7 : vector<8x128xf32>
    %11 = arith.mulf %7, %7 : vector<8x128xf32>
    %12 = arith.addf %3, %11 : vector<8x128xf32>
    %13 = arith.addf %3, %9 : vector<8x128xf32>
    %14 = arith.mulf %9, %9 : vector<8x128xf32>
    %15 = arith.addf %3, %14 : vector<8x128xf32>
    %c1_i32 = arith.constant 1 : i32
    %c8_i32_3 = arith.constant 8 : i32
    %16 = arith.muli %c1_i32, %c8_i32_3 : i32
    %17 = tpu.assume_multiple %16, 8 : i32
    %18 = arith.index_cast %17 : i32 to index
    %c0_4 = arith.constant 0 : index
    %19 = vector.load %arg2[%18, %c0_4] : memref<16x128xf32, #tpu.memory_space<vmem>>, vector<8x128xf32>
    %20 = arith.index_cast %17 : i32 to index
    %c0_5 = arith.constant 0 : index
    %21 = vector.load %arg3[%20, %c0_5] : memref<16x128xf32, #tpu.memory_space<vmem>>, vector<8x128xf32>
    %22 = arith.addf %10, %19 : vector<8x128xf32>
    %23 = arith.mulf %19, %19 : vector<8x128xf32>
    %24 = arith.addf %12, %23 : vector<8x128xf32>
    %25 = arith.addf %13, %21 : vector<8x128xf32>
    %26 = arith.mulf %21, %21 : vector<8x128xf32>
    %27 = arith.addf %15, %26 : vector<8x128xf32>
    %c2_i32 = arith.constant 2 : i32
    %c0_6 = arith.constant 0 : index
    %c0_7 = arith.constant 0 : index
    %c0_8 = arith.constant 0 : index
    %c0_9 = arith.constant 0 : index
    %28 = vector.load %arg4[%c0_6, %c0_7, %c0_8, %c0_9] : memref<1x4x8x128xf32, #tpu.memory_space<vmem>>, vector<1x1x8x128xf32>
    %29 = vector.shape_cast %28 : vector<1x1x8x128xf32> to vector<8x128xf32>
    %30 = arith.addf %29, %22 : vector<8x128xf32>
    %c0_10 = arith.constant 0 : index
    %c0_11 = arith.constant 0 : index
    %c0_12 = arith.constant 0 : index
    %c0_13 = arith.constant 0 : index
    %31 = vector.load %arg4[%c0_10, %c0_11, %c0_12, %c0_13] : memref<1x4x8x128xf32, #tpu.memory_space<vmem>>, vector<1x1x8x128xf32>
    %32 = vector.shape_cast %31 : vector<1x1x8x128xf32> to vector<8x128xf32>
    %33 = vector.shape_cast %30 : vector<8x128xf32> to vector<1x1x8x128xf32>
    tpu.vector_store %arg4[%c0_10, %c0_11, %c0_12, %c0_13], %33 {strides = array<i32>} : memref<1x4x8x128xf32, #tpu.memory_space<vmem>>, vector<1x1x8x128xf32>,
    %c0_14 = arith.constant 0 : index
    %c1 = arith.constant 1 : index
    %c0_15 = arith.constant 0 : index
    %c0_16 = arith.constant 0 : index
    %34 = vector.load %arg4[%c0_14, %c1, %c0_15, %c0_16] : memref<1x4x8x128xf32, #tpu.memory_space<vmem>>, vector<1x1x8x128xf32>
    %35 = vector.shape_cast %34 : vector<1x1x8x128xf32> to vector<8x128xf32>
    %36 = arith.addf %35, %24 : vector<8x128xf32>
    %c0_17 = arith.constant 0 : index
    %c1_18 = arith.constant 1 : index
    %c0_19 = arith.constant 0 : index
    %c0_20 = arith.constant 0 : index
    %37 = vector.load %arg4[%c0_17, %c1_18, %c0_19, %c0_20] : memref<1x4x8x128xf32, #tpu.memory_space<vmem>>, vector<1x1x8x128xf32>
    %38 = vector.shape_cast %37 : vector<1x1x8x128xf32> to vector<8x128xf32>
    %39 = vector.shape_cast %36 : vector<8x128xf32> to vector<1x1x8x128xf32>
    tpu.vector_store %arg4[%c0_17, %c1_18, %c0_19, %c0_20], %39 {strides = array<i32>} : memref<1x4x8x128xf32, #tpu.memory_space<vmem>>, vector<1x1x8x128xf32>,
    %c0_21 = arith.constant 0 : index
    %c2 = arith.constant 2 : index
    %c0_22 = arith.constant 0 : index
    %c0_23 = arith.constant 0 : index
    %40 = vector.load %arg4[%c0_21, %c2, %c0_22, %c0_23] : memref<1x4x8x128xf32, #tpu.memory_space<vmem>>, vector<1x1x8x128xf32>
    %41 = vector.shape_cast %40 : vector<1x1x8x128xf32> to vector<8x128xf32>
    %42 = arith.addf %41, %25 : vector<8x128xf32>
    %c0_24 = arith.constant 0 : index
    %c2_25 = arith.constant 2 : index
    %c0_26 = arith.constant 0 : index
    %c0_27 = arith.constant 0 : index
    %43 = vector.load %arg4[%c0_24, %c2_25, %c0_26, %c0_27] : memref<1x4x8x128xf32, #tpu.memory_space<vmem>>, vector<1x1x8x128xf32>
    %44 = vector.shape_cast %43 : vector<1x1x8x128xf32> to vector<8x128xf32>
    %45 = vector.shape_cast %42 : vector<8x128xf32> to vector<1x1x8x128xf32>
    tpu.vector_store %arg4[%c0_24, %c2_25, %c0_26, %c0_27], %45 {strides = array<i32>} : memref<1x4x8x128xf32, #tpu.memory_space<vmem>>, vector<1x1x8x128xf32>,
    %c0_28 = arith.constant 0 : index
    %c3 = arith.constant 3 : index
    %c0_29 = arith.constant 0 : index
    %c0_30 = arith.constant 0 : index
    %46 = vector.load %arg4[%c0_28, %c3, %c0_29, %c0_30] : memref<1x4x8x128xf32, #tpu.memory_space<vmem>>, vector<1x1x8x128xf32>
    %47 = vector.shape_cast %46 : vector<1x1x8x128xf32> to vector<8x128xf32>
    %48 = arith.addf %47, %27 : vector<8x128xf32>
    %c0_31 = arith.constant 0 : index
    %c3_32 = arith.constant 3 : index
    %c0_33 = arith.constant 0 : index
    %c0_34 = arith.constant 0 : index
    %49 = vector.load %arg4[%c0_31, %c3_32, %c0_33, %c0_34] : memref<1x4x8x128xf32, #tpu.memory_space<vmem>>, vector<1x1x8x128xf32>
    %50 = vector.shape_cast %49 : vector<1x1x8x128xf32> to vector<8x128xf32>
    %51 = vector.shape_cast %48 : vector<8x128xf32> to vector<1x1x8x128xf32>
    tpu.vector_store %arg4[%c0_31, %c3_32, %c0_33, %c0_34], %51 {strides = array<i32>} : memref<1x4x8x128xf32, #tpu.memory_space<vmem>>, vector<1x1x8x128xf32>,
    return
  }
  func.func @transform_0(%arg0: i32, %arg1: i32) -> (i32, i32) {
    %c1_i32 = arith.constant 1 : i32
    %0 = arith.muli %arg0, %c1_i32 : i32
    %1 = arith.addi %0, %arg1 : i32
    %c0_i32 = arith.constant 0 : i32
    %c0_i32_0 = arith.constant 0 : i32
    return %1, %c0_i32 : i32, i32
  }
  func.func @transform_1(%arg0: i32, %arg1: i32) -> (i32, i32) {
    %c1_i32 = arith.constant 1 : i32
    %0 = arith.muli %arg0, %c1_i32 : i32
    %1 = arith.addi %0, %arg1 : i32
    %c0_i32 = arith.constant 0 : i32
    %c0_i32_0 = arith.constant 0 : i32
    return %1, %c0_i32 : i32, i32
  }
  func.func @transform_2(%arg0: i32, %arg1: i32) -> (i32, i32, i32, i32) {
    %c0_i32 = arith.constant 0 : i32
    %c0_i32_0 = arith.constant 0 : i32
    %c0_i32_1 = arith.constant 0 : i32
    %c0_i32_2 = arith.constant 0 : i32
    return %arg0, %c0_i32, %c0_i32_0, %c0_i32_1 : i32, i32, i32, i32
  }
}

</mosaic_0001>

<bundles_post_ra>
// kernel: tpu_custom_call.1
= control target key start
LH: loop header
LB: loop body
LE: loop exit
PB: predicated region body
PF: predicated region fallthrough
CT: control target
= control target key end

     0   :  { %7 = vsyncpa [#allocation3], 0  ;;  %s221_s0 = inlined_call_operand.hbm [shape: f32[16,128], index: 0, kind: input, shape index: {}]   ;;  %s222_s1 = inlined_call_operand.hbm [shape: f32[16,128], index: 1, kind: input, shape index: {}]   ;;  %s223_s2 = inlined_call_operand.hbm [shape: f32[1,4,8,128], index: 2, kind: output, shape index: {}]  }
   0x1   :  { %8 = vsyncpa [#allocation6], 0 }
   0x2   :  { %9 = vsyncpa [#allocation4], 0  ;;  %s183_s9 = smov [#allocation2]  }
   0x3   :  { %s19_s10 = sshll.u32 %s183_s9, 4  ;;  %s20_s10 = int_to_ptr.vmem [resolvable:$true] %s19_s10 }
   0x4   :  { %s125_s11 = scalar_lea.vmem %s20_s10, 256  ;;  %p130_p1 = scmp.lt.s32.totalorder %s20_s10, %s20_s10 }
   0x5   :  { %p126_p0 = scmp.ne.s32.totalorder %s20_s10, %s125_s11  ;;  %p131_p2 = scmp.lt.s32.totalorder %s125_s11, %s125_s11 }
   0x7   :  { %p132_p3 = por %p131_p2, %p130_p1 }
   0x9   :  { %p133_p4 = pnand %p132_p3, %p126_p0 }
   0xb   :  { %136 = shalt.err (!%p133_p4)
}
   0xc   :  { %s184_s12 = smov 128   ;;  %s185_s13 = smov 8  }
   0xd   :  { %25 = dma.hbm_to_vmem [thread:$0]  %s221_s0, 256, %s20_s10, [#allocation3], %s184_s12, %s184_s12, %s185_s13  }
   0xe   :  { %s186_s16 = smov [#allocation5]  }
   0xf   :  { %s35_s17 = sshll.u32 %s186_s16, 4  ;;  %s36_s17 = int_to_ptr.vmem [resolvable:$true] %s35_s17 }
  0x10   :  { %s145_s18 = scalar_lea.vmem %s36_s17, 256  ;;  %p150_p6 = scmp.lt.s32.totalorder %s36_s17, %s36_s17 }
  0x11   :  { %p146_p5 = scmp.ne.s32.totalorder %s36_s17, %s145_s18  ;;  %p151_p7 = scmp.lt.s32.totalorder %s145_s18, %s145_s18 }
  0x13   :  { %p152_p8 = por %p151_p7, %p150_p6 }
  0x15   :  { %p153_p9 = pnand %p152_p8, %p146_p5 }
  0x17   :  { %156 = shalt.err (!%p153_p9)
}
  0x18   :  { %41 = dma.hbm_to_vmem [thread:$0]  %s222_s1, 256, %s36_s17, [#allocation6], %s184_s12, %s184_s12, %s185_s13  }
  0x19   :  { %177 = dma.done.wait [#allocation3], 256  }
  0x1a   :  { %178 = vsyncadd [#allocation3], 4294967040 }
  0x1b   :  { %179 = dma.done.wait [#allocation6], 256  }
  0x1c   :  { %180 = vsyncadd [#allocation6], 4294967040  ;;  %v60_v0 = vld [vmem:[#allocation2] sm:$0xff]  ;;  %v69_v1 = vld [vmem:[#allocation2 + $0x8] sm:$0xff]  ;;  %s187_s0 = smov [#allocation7]  }
  0x1d   :  { %v61_v2 = vld [vmem:[#allocation5] sm:$0xff]  ;;  %v72_v3 = vadd.f32 %v69_v1, %v60_v0  ;;  %v63_v4 = vmul.f32 %v60_v0, %v60_v0  ;;  %v73_v5 = vmul.f32 %v69_v1, %v69_v1  ;;  %v71_v6 = vld [vmem:[#allocation5 + $0x8] sm:$0xff]  ;;  %s98_s21 = sshll.u32 %s187_s0, 4  ;;  %s99_s21 = int_to_ptr.vmem [resolvable:$true] %s98_s21 }
  0x1e   :  { %v66_v7 = vmul.f32 %v61_v2, %v61_v2  ;;  %v75_v8 = vadd.f32 %v71_v6, %v61_v2  ;;  %v76_v9 = vmul.f32 %v71_v6, %v71_v6  ;;  %s157_s1 = scalar_lea.vmem %s99_s21, 512  ;;  %p162_p11 = scmp.lt.s32.totalorder %s99_s21, %s99_s21 }
  0x1f   :  { %v74_v10 = vadd.f32 %v73_v5, %v63_v4  ;;  %80 = vst [vmem:[#allocation7] sm:$0xff] %v72_v3  ;;  %p158_p10 = scmp.ne.s32.totalorder %s99_s21, %s157_s1  ;;  %p163_p12 = scmp.lt.s32.totalorder %s157_s1, %s157_s1 }
  0x20   :  { %v77_v11 = vadd.f32 %v76_v9, %v66_v7  ;;  %88 = vst [vmem:[#allocation7 + $0x10] sm:$0xff] %v75_v8 }
  0x21   :  { %84 = vst [vmem:[#allocation7 + $0x8] sm:$0xff] %v74_v10  ;;  %p164_p13 = por %p163_p12, %p162_p11 }
  0x22   :  { %92 = vst [vmem:[#allocation7 + $0x18] sm:$0xff] %v77_v11 }
  0x23   :  { %p165_p0 = pnand %p164_p13, %p158_p10 }
  0x25   :  { %168 = shalt.err (!%p165_p0)
}
  0x26   :  { %104 = dma.vmem_to_hbm [thread:$0]  %s99_s21, 512, %s223_s2, [#allocation4], %s184_s12, %s184_s12, %s185_s13  }
  0x27   :  { %181 = dma.done.wait [#allocation4], 512  }
  0x28   :  { %182 = vsyncadd [#allocation4], 4294966784 }
  0x29   :  { %108 = vsyncpa [#allocation3], 1 }
  0x2a   :  { %109 = vsyncpa [#allocation6], 1 }
  0x2b   :  { %110 = vsyncpa [#allocation4], 1 }

</bundles_post_ra>
